<compile_context>
chip_gen: v6e
topology: v6e:2x2x1
jax: 0.10.0
libtpu: 0.0.40
codegen_flags: <defaults>
</compile_context>

<pallas_src>
import functools
import math

import jax
import jax.numpy as jnp
from jax import lax
from jax.experimental import pallas as pl
from jax.experimental.pallas import tpu as pltpu


def attention_kernel(xq_ref, xk_ref, xv_ref, w_ref, b_ref, o_ref,
                     q_s, k_s, v_s, *, block_b, seq_len, d_k, mxu_dtype):
    """One grid step = `block_b` batch elements.

    xq/xk/xv : (block_b*seq_len, D)  f32 batch-block of inputs
    w_ref    : (3, D, DKP)           stacked, zero-padded [Wq*scale, Wk, Wv] (bf16)
    b_ref    : (3, 1, DKP)           stacked, zero-padded [bq*scale, bk, bv] (f32)
    o_ref    : (block_b*seq_len, d_k) compact output block
    q_s/k_s/v_s : (block_b*seq_len, DKP) f32 VMEM scratch for the projections
    """
    # Hoisted weight / bias loads (once per grid step, outside the batch loop).
    wq = w_ref[0]          # (D, DKP) mxu_dtype
    wk = w_ref[1]
    wv = w_ref[2]
    bq = b_ref[0]          # (1, DKP) f32
    bk = b_ref[1]
    bv = b_ref[2]

    # Projections over the whole batch block: bf16 MXU operands (in-kernel cast
    # of the f32 inputs is a cheap VPU op), f32 accumulation, f32 bias add.
    # Scale is already folded into wq / bq.
    xq = xq_ref[...].astype(mxu_dtype)
    xk = xk_ref[...].astype(mxu_dtype)
    xv = xv_ref[...].astype(mxu_dtype)
    q_s[...] = jnp.dot(xq, wq, preferred_element_type=jnp.float32) + bq
    k_s[...] = jnp.dot(xk, wk, preferred_element_type=jnp.float32) + bk
    v_s[...] = jnp.dot(xv, wv, preferred_element_type=jnp.float32) + bv

    S = seq_len

    def body(bb, carry):
        # pl.ds views of the scratch refs are free (no VMEM copies).
        start = pl.multiple_of(bb * S, S)
        qb = q_s[pl.ds(start, S), :].astype(mxu_dtype)   # (S, DKP)
        kb = k_s[pl.ds(start, S), :].astype(mxu_dtype)
        vb = v_s[pl.ds(start, S), :].astype(mxu_dtype)

        # scores = qb @ kb^T without materializing a transpose: contract the
        # last dim of both operands.  Zero-padded d_k columns contribute 0.
        s = lax.dot_general(qb, kb, (((1,), (1,)), ((), ())),
                            preferred_element_type=jnp.float32)      # (S, S)

        # Numerically stable softmax; division via EUP approx reciprocal.
        m = jnp.max(s, axis=-1, keepdims=True)
        p = jnp.exp(s - m)
        denom = jnp.sum(p, axis=-1, keepdims=True)
        p = (p * pl.reciprocal(denom, approx=True)).astype(mxu_dtype)

        ob = jnp.dot(p, vb, preferred_element_type=jnp.float32)      # (S, DKP)
        # Compact store: only the d_k useful lanes go back to HBM.
        o_ref[pl.ds(start, S), :] = ob[:, :d_k].astype(o_ref.dtype)
        return carry

    # Bounded-live-range unrolled loop over the batch elements of this block.
    lax.fori_loop(0, block_b, body, 0, unroll=True)


def _choose_block_b(B, S, D, dkp, d_k, in_bytes, w_bytes, budget_bytes,
                    max_block_b):
    """Largest batch-block size that (a) divides B, (b) leaves >=2 grid steps
    when B >= 2 (v7x megacore), and (c) fits the per-step VMEM budget."""
    cap = max(1, min(max_block_b, B // 2 if B >= 2 else B))
    for bb in range(cap, 0, -1):
        if B % bb:
            continue
        rows = bb * S
        est = (2 * 3 * rows * D * in_bytes                  # dbl-buffered x blocks
               + 2 * rows * d_k * 4                         # dbl-buffered output block
               + 2 * (3 * D * dkp * w_bytes + 3 * dkp * 4)  # dbl-buffered W (mxu) + b (f32)
               + 3 * rows * dkp * 4                         # q/k/v f32 scratch
               + 8 * S * S * 4)                             # scores / softmax temporaries
        if est <= budget_bytes:
            return bb
    return 1


def attention_forward(q, k, v, wq, bq, wk, bk, wv, bv, *,
                      mxu_dtype=jnp.bfloat16,
                      vmem_block_budget=20 * 1024 * 1024,
                      vmem_limit_bytes=32 * 1024 * 1024,
                      max_block_b=64):
    """q, k, v: (B, S, d_model); weights (d_model, d_k); biases (d_k,)."""
    B, S, D = q.shape
    d_k = wq.shape[1]
    dkp = ((d_k + 127) // 128) * 128            # lane-dense padded width
    scale = 1.0 / math.sqrt(d_k)

    # Fold the 1/sqrt(d_k) scale into the query projection (in f32, before the
    # bf16 cast of the weights); pad d_k -> dkp with exact zeros.
    def pad_w(w, s=1.0):
        return jnp.zeros((D, dkp), jnp.float32).at[:, :d_k].set(
            w.astype(jnp.float32) * s)

    def pad_b(b, s=1.0):
        return jnp.zeros((1, dkp), jnp.float32).at[:, :d_k].set(
            b.astype(jnp.float32) * s)

    w_all = jnp.stack([pad_w(wq, scale), pad_w(wk), pad_w(wv)]).astype(mxu_dtype)
    b_all = jnp.stack([pad_b(bq, scale), pad_b(bk), pad_b(bv)])   # keep f32

    in_bytes = q.dtype.itemsize
    w_bytes = jnp.dtype(mxu_dtype).itemsize
    bb = _choose_block_b(B, S, D, dkp, d_k, in_bytes, w_bytes,
                         vmem_block_budget, max_block_b)
    rows = bb * S

    # Free (contiguous) host-side reshapes so the kernel works on 2-D slabs.
    q2 = q.reshape(B * S, D)
    k2 = k.reshape(B * S, D)
    v2 = v.reshape(B * S, D)

    x_spec = pl.BlockSpec((rows, D), lambda i: (i, 0))
    w_spec = pl.BlockSpec((3, D, dkp), lambda i: (0, 0, 0))
    b_spec = pl.BlockSpec((3, 1, dkp), lambda i: (0, 0, 0))
    o_spec = pl.BlockSpec((rows, d_k), lambda i: (i, 0))

    kernel = functools.partial(attention_kernel, block_b=bb, seq_len=S,
                               d_k=d_k, mxu_dtype=mxu_dtype)

    out = pl.pallas_call(
        kernel,
        out_shape=jax.ShapeDtypeStruct((B * S, d_k), q.dtype),
        grid_spec=pltpu.PrefetchScalarGridSpec(
            num_scalar_prefetch=0,
            grid=(B // bb,),
            in_specs=[x_spec, x_spec, x_spec, w_spec, b_spec],
            out_specs=o_spec,
            scratch_shapes=[pltpu.VMEM((rows, dkp), jnp.float32)] * 3,
        ),
        compiler_params=pltpu.CompilerParams(
            dimension_semantics=("parallel",),
            vmem_limit_bytes=vmem_limit_bytes),
    )(q2, k2, v2, w_all, b_all)

    # Contiguous reshape back to the module's (B, S, d_k) layout (no slice pass).
    return out.reshape(B, S, d_k)


def reference_forward(q, k, v, wq, bq, wk, bk, wv, bv, d_k):
    qp = q @ wq + bq
    kp = k @ wk + bk
    vp = v @ wv + bv
    x = jnp.einsum("bqd,bkd->bqk", qp, kp) / math.sqrt(d_k)
    x = jax.nn.softmax(x, axis=-1)
    return jnp.einsum("bqk,bkd->bqd", x, vp)


if __name__ == "__main__":
    # Small shapes consistent with the module: batch=2, seq=8, d_model=32, d_k=16.
    B, S, D, DK = 2, 8, 32, 16

    key = jax.random.PRNGKey(0)
    k_q, k_k, k_v, k_wq, k_wk, k_wv, k_bq, k_bk, k_bv = jax.random.split(key, 9)

    q = jax.random.normal(k_q, (B, S, D), dtype=jnp.float32)
    k = jax.random.normal(k_k, (B, S, D), dtype=jnp.float32)
    v = jax.random.normal(k_v, (B, S, D), dtype=jnp.float32)

    # Deterministic parameter init (uniform, akin to nn.Linear's default scale).
    bound = 1.0 / math.sqrt(D)
    wq = jax.random.uniform(k_wq, (D, DK), jnp.float32, -bound, bound)
    wk = jax.random.uniform(k_wk, (D, DK), jnp.float32, -bound, bound)
    wv = jax.random.uniform(k_wv, (D, DK), jnp.float32, -bound, bound)
    bq = jax.random.uniform(k_bq, (DK,), jnp.float32, -bound, bound)
    bk = jax.random.uniform(k_bk, (DK,), jnp.float32, -bound, bound)
    bv = jax.random.uniform(k_bv, (DK,), jnp.float32, -bound, bound)

    out = attention_forward(q, k, v, wq, bq, wk, bk, wv, bv)
    out = jax.block_until_ready(out)

    ref = reference_forward(q, k, v, wq, bq, wk, bk, wv, bv, DK)
    assert out.shape == (B, S, DK)
    # bf16 MXU operands (+ approx reciprocal in the softmax) introduce ~1e-2
    # level relative error vs the f32 reference; tolerance chosen accordingly.
    assert jnp.allclose(out, ref, atol=2.5e-2, rtol=2.5e-2), "mismatch vs reference"

    print("KERNEL_OK")
</pallas_src>

<mosaic_0001>
module attributes {stable_mosaic.version = 11 : i64} {
  func.func @attention_kernel(%arg0: i32, %arg1: memref<8x32xf32, #tpu.memory_space<vmem>>, %arg2: memref<8x32xf32, #tpu.memory_space<vmem>>, %arg3: memref<8x32xf32, #tpu.memory_space<vmem>>, %arg4: memref<3x32x128xbf16, #tpu.memory_space<vmem>>, %arg5: memref<3x1x128xf32, #tpu.memory_space<vmem>>, %arg6: memref<8x16xf32, #tpu.memory_space<vmem>>, %arg7: memref<8x128xf32, #tpu.memory_space<vmem>>, %arg8: memref<8x128xf32, #tpu.memory_space<vmem>>, %arg9: memref<8x128xf32, #tpu.memory_space<vmem>>) attributes {dimension_semantics = [#tpu.dimension_semantics<parallel>], iteration_bounds = array<i64: 2>, scalar_prefetch = 0 : i64, scratch_operands = 3 : i64, tpu.core_type = #tpu.core_type<tc>, window_params = [{transform_indices = @transform_0, window_bounds = array<i64: 8, 32>}, {transform_indices = @transform_1, window_bounds = array<i64: 8, 32>}, {transform_indices = @transform_2, window_bounds = array<i64: 8, 32>}, {pipeline_mode = #tpu.pipeline_mode<synchronous>, transform_indices = @transform_3, window_bounds = array<i64: 3, 32, 128>}, {pipeline_mode = #tpu.pipeline_mode<synchronous>, transform_indices = @transform_4, window_bounds = array<i64: 3, 1, 128>}, {transform_indices = @transform_5, window_bounds = array<i64: 8, 16>}]} {
    %c0 = arith.constant 0 : index
    %c0_0 = arith.constant 0 : index
    %c0_1 = arith.constant 0 : index
    %0 = vector.load %arg4[%c0, %c0_0, %c0_1] : memref<3x32x128xbf16, #tpu.memory_space<vmem>>, vector<1x32x128xbf16>
    %1 = vector.shape_cast %0 : vector<1x32x128xbf16> to vector<32x128xbf16>
    %c1 = arith.constant 1 : index
    %c0_2 = arith.constant 0 : index
    %c0_3 = arith.constant 0 : index
    %2 = vector.load %arg4[%c1, %c0_2, %c0_3] : memref<3x32x128xbf16, #tpu.memory_space<vmem>>, vector<1x32x128xbf16>
    %3 = vector.shape_cast %2 : vector<1x32x128xbf16> to vector<32x128xbf16>
    %c2 = arith.constant 2 : index
    %c0_4 = arith.constant 0 : index
    %c0_5 = arith.constant 0 : index
    %4 = vector.load %arg4[%c2, %c0_4, %c0_5] : memref<3x32x128xbf16, #tpu.memory_space<vmem>>, vector<1x32x128xbf16>
    %5 = vector.shape_cast %4 : vector<1x32x128xbf16> to vector<32x128xbf16>
    %c0_6 = arith.constant 0 : index
    %c0_7 = arith.constant 0 : index
    %c0_8 = arith.constant 0 : index
    %6 = vector.load %arg5[%c0_6, %c0_7, %c0_8] : memref<3x1x128xf32, #tpu.memory_space<vmem>>, vector<1x1x128xf32>
    %7 = vector.shape_cast %6 : vector<1x1x128xf32> to vector<1x128xf32>
    %c1_9 = arith.constant 1 : index
    %c0_10 = arith.constant 0 : index
    %c0_11 = arith.constant 0 : index
    %8 = vector.load %arg5[%c1_9, %c0_10, %c0_11] : memref<3x1x128xf32, #tpu.memory_space<vmem>>, vector<1x1x128xf32>
    %9 = vector.shape_cast %8 : vector<1x1x128xf32> to vector<1x128xf32>
    %c2_12 = arith.constant 2 : index
    %c0_13 = arith.constant 0 : index
    %c0_14 = arith.constant 0 : index
    %10 = vector.load %arg5[%c2_12, %c0_13, %c0_14] : memref<3x1x128xf32, #tpu.memory_space<vmem>>, vector<1x1x128xf32>
    %11 = vector.shape_cast %10 : vector<1x1x128xf32> to vector<1x128xf32>
    %c0_15 = arith.constant 0 : index
    %c0_16 = arith.constant 0 : index
    %12 = vector.load %arg1[%c0_15, %c0_16] : memref<8x32xf32, #tpu.memory_space<vmem>>, vector<8x32xf32>
    %13 = arith.truncf %12 : vector<8x32xf32> to vector<8x32xbf16>
    %c0_17 = arith.constant 0 : index
    %c0_18 = arith.constant 0 : index
    %14 = vector.load %arg2[%c0_17, %c0_18] : memref<8x32xf32, #tpu.memory_space<vmem>>, vector<8x32xf32>
    %15 = arith.truncf %14 : vector<8x32xf32> to vector<8x32xbf16>
    %c0_19 = arith.constant 0 : index
    %c0_20 = arith.constant 0 : index
    %16 = vector.load %arg3[%c0_19, %c0_20] : memref<8x32xf32, #tpu.memory_space<vmem>>, vector<8x32xf32>
    %17 = arith.truncf %16 : vector<8x32xf32> to vector<8x32xbf16>
    %cst = arith.constant dense<0.000000e+00> : vector<8x128xf32>
    %18 = tpu.matmul %13, %1, %cst {dimension_numbers = #tpu.dot_dimension_numbers<[1], [0], [0], [1], [0, 0, 1, 1], [], []>} : vector<8x32xbf16>, vector<32x128xbf16>, vector<8x128xf32> -> vector<8x128xf32>
    %19 = vector.broadcast %7 : vector<1x128xf32> to vector<8x128xf32>
    %20 = arith.addf %18, %19 : vector<8x128xf32>
    %c0_21 = arith.constant 0 : index
    %c0_22 = arith.constant 0 : index
    %21 = vector.load %arg7[%c0_21, %c0_22] : memref<8x128xf32, #tpu.memory_space<vmem>>, vector<8x128xf32>
    tpu.vector_store %arg7[%c0_21, %c0_22], %20 {strides = array<i32>} : memref<8x128xf32, #tpu.memory_space<vmem>>, vector<8x128xf32>,
    %cst_23 = arith.constant dense<0.000000e+00> : vector<8x128xf32>
    %22 = tpu.matmul %15, %3, %cst_23 {dimension_numbers = #tpu.dot_dimension_numbers<[1], [0], [0], [1], [0, 0, 1, 1], [], []>} : vector<8x32xbf16>, vector<32x128xbf16>, vector<8x128xf32> -> vector<8x128xf32>
    %23 = vector.broadcast %9 : vector<1x128xf32> to vector<8x128xf32>
    %24 = arith.addf %22, %23 : vector<8x128xf32>
    %c0_24 = arith.constant 0 : index
    %c0_25 = arith.constant 0 : index
    %25 = vector.load %arg8[%c0_24, %c0_25] : memref<8x128xf32, #tpu.memory_space<vmem>>, vector<8x128xf32>
    tpu.vector_store %arg8[%c0_24, %c0_25], %24 {strides = array<i32>} : memref<8x128xf32, #tpu.memory_space<vmem>>, vector<8x128xf32>,
    %cst_26 = arith.constant dense<0.000000e+00> : vector<8x128xf32>
    %26 = tpu.matmul %17, %5, %cst_26 {dimension_numbers = #tpu.dot_dimension_numbers<[1], [0], [0], [1], [0, 0, 1, 1], [], []>} : vector<8x32xbf16>, vector<32x128xbf16>, vector<8x128xf32> -> vector<8x128xf32>
    %27 = vector.broadcast %11 : vector<1x128xf32> to vector<8x128xf32>
    %28 = arith.addf %26, %27 : vector<8x128xf32>
    %c0_27 = arith.constant 0 : index
    %c0_28 = arith.constant 0 : index
    %29 = vector.load %arg9[%c0_27, %c0_28] : memref<8x128xf32, #tpu.memory_space<vmem>>, vector<8x128xf32>
    tpu.vector_store %arg9[%c0_27, %c0_28], %28 {strides = array<i32>} : memref<8x128xf32, #tpu.memory_space<vmem>>, vector<8x128xf32>,
    %c0_i32 = arith.constant 0 : i32
    %c8_i32 = arith.constant 8 : i32
    %30 = arith.muli %c0_i32, %c8_i32 : i32
    %31 = tpu.assume_multiple %30, 8 : i32
    %32 = arith.index_cast %31 : i32 to index
    %c0_29 = arith.constant 0 : index
    %33 = vector.load %arg7[%32, %c0_29] : memref<8x128xf32, #tpu.memory_space<vmem>>, vector<8x128xf32>
    %34 = arith.truncf %33 : vector<8x128xf32> to vector<8x128xbf16>
    %35 = arith.index_cast %31 : i32 to index
    %c0_30 = arith.constant 0 : index
    %36 = vector.load %arg8[%35, %c0_30] : memref<8x128xf32, #tpu.memory_space<vmem>>, vector<8x128xf32>
    %37 = arith.truncf %36 : vector<8x128xf32> to vector<8x128xbf16>
    %38 = arith.index_cast %31 : i32 to index
    %c0_31 = arith.constant 0 : index
    %39 = vector.load %arg9[%38, %c0_31] : memref<8x128xf32, #tpu.memory_space<vmem>>, vector<8x128xf32>
    %40 = arith.truncf %39 : vector<8x128xf32> to vector<8x128xbf16>
    %cst_32 = arith.constant dense<0.000000e+00> : vector<8x8xf32>
    %41 = tpu.matmul %34, %37, %cst_32 {dimension_numbers = #tpu.dot_dimension_numbers<[1], [1], [0], [0], [0, 0, 1, 0], [], []>} : vector<8x128xbf16>, vector<8x128xbf16>, vector<8x8xf32> -> vector<8x8xf32>
    %cst_33 = arith.constant dense<0xFF800000> : vector<8xf32>
    %42 = vector.multi_reduction <maximumf>, %41, %cst_33 [1] : vector<8x8xf32> to vector<8xf32>
    %43 = vector.shape_cast %42 : vector<8xf32> to vector<8x1xf32>
    %44 = vector.broadcast %43 : vector<8x1xf32> to vector<8x8xf32>
    %45 = arith.subf %41, %44 : vector<8x8xf32>
    %46 = math.exp %45 : vector<8x8xf32>
    %cst_34 = arith.constant dense<0.000000e+00> : vector<8xf32>
    %47 = vector.multi_reduction <add>, %46, %cst_34 [1] : vector<8x8xf32> to vector<8xf32>
    %48 = vector.shape_cast %47 : vector<8xf32> to vector<8x1xf32>
    %49 = tpu.reciprocal %48 {approx = true} : vector<8x1xf32> -> vector<8x1xf32>
    %50 = vector.broadcast %49 : vector<8x1xf32> to vector<8x8xf32>
    %51 = arith.mulf %46, %50 : vector<8x8xf32>
    %52 = arith.truncf %51 : vector<8x8xf32> to vector<8x8xbf16>
    %cst_35 = arith.constant dense<0.000000e+00> : vector<8x128xf32>
    %53 = tpu.matmul %52, %40, %cst_35 {dimension_numbers = #tpu.dot_dimension_numbers<[1], [0], [0], [1], [0, 0, 1, 1], [], []>} : vector<8x8xbf16>, vector<8x128xbf16>, vector<8x128xf32> -> vector<8x128xf32>
    %54 = vector.extract_strided_slice %53 {offsets = [0, 0], sizes = [8, 16], strides = [1, 1]} : vector<8x128xf32> to vector<8x16xf32>
    %55 = arith.index_cast %31 : i32 to index
    %c0_36 = arith.constant 0 : index
    %56 = vector.load %arg6[%55, %c0_36] : memref<8x16xf32, #tpu.memory_space<vmem>>, vector<8x16xf32>
    tpu.vector_store %arg6[%55, %c0_36], %54 {strides = array<i32>} : memref<8x16xf32, #tpu.memory_space<vmem>>, vector<8x16xf32>,
    %c1_i32 = arith.constant 1 : i32
    return
  }
  func.func @transform_0(%arg0: i32) -> (i32, i32) {
    %c0_i32 = arith.constant 0 : i32
    %c0_i32_0 = arith.constant 0 : i32
    return %arg0, %c0_i32 : i32, i32
  }
  func.func @transform_1(%arg0: i32) -> (i32, i32) {
    %c0_i32 = arith.constant 0 : i32
    %c0_i32_0 = arith.constant 0 : i32
    return %arg0, %c0_i32 : i32, i32
  }
  func.func @transform_2(%arg0: i32) -> (i32, i32) {
    %c0_i32 = arith.constant 0 : i32
    %c0_i32_0 = arith.constant 0 : i32
    return %arg0, %c0_i32 : i32, i32
  }
  func.func @transform_3(%arg0: i32) -> (i32, i32, i32) {
    %c0_i32 = arith.constant 0 : i32
    %c0_i32_0 = arith.constant 0 : i32
    %c0_i32_1 = arith.constant 0 : i32
    %c0_i32_2 = arith.constant 0 : i32
    return %c0_i32, %c0_i32_0, %c0_i32_1 : i32, i32, i32
  }
  func.func @transform_4(%arg0: i32) -> (i32, i32, i32) {
    %c0_i32 = arith.constant 0 : i32
    %c0_i32_0 = arith.constant 0 : i32
    %c0_i32_1 = arith.constant 0 : i32
    %c0_i32_2 = arith.constant 0 : i32
    return %c0_i32, %c0_i32_0, %c0_i32_1 : i32, i32, i32
  }
  func.func @transform_5(%arg0: i32) -> (i32, i32) {
    %c0_i32 = arith.constant 0 : i32
    %c0_i32_0 = arith.constant 0 : i32
    return %arg0, %c0_i32 : i32, i32
  }
}

</mosaic_0001>

<bundles_post_ra>
// kernel: tpu_custom_call.1
= control target key start
LH: loop header
LB: loop body
LE: loop exit
PB: predicated region body
PF: predicated region fallthrough
CT: control target
= control target key end

     0   :  { %s1450_s0 = inlined_call_operand.hbm [shape: f32[16,32], index: 0, kind: input, shape index: {}]   ;;  %s1451_s1 = inlined_call_operand.hbm [shape: f32[16,32], index: 1, kind: input, shape index: {}]   ;;  %s1452_s2 = inlined_call_operand.hbm [shape: f32[16,32], index: 2, kind: input, shape index: {}]   ;;  %s1453_s3 = inlined_call_operand.hbm [shape: bf16[3,32,128], index: 3, kind: input, shape index: {}]   ;;  %s1454_s4 = inlined_call_operand.vmem [shape: f32[3,1,128], index: 4, kind: input, shape index: {}]   ;;  %s1455_s5 = inlined_call_operand.hbm [shape: f32[16,16], index: 5, kind: output, shape index: {}]  }
   0x1   :  { %1468 = sst [smem:[#allocation23_spill]] %s1451_s1 }
   0x2   :  { %1469 = sst [smem:[#allocation24_spill]] %s1455_s5 }
   0x3   :  { %10 = vsyncpa [#allocation6], 0 }
   0x4   :  { %12 = vsyncpa [#allocation6 + $0x1], 0 }
   0x5   :  { %13 = vsyncpa [#allocation9], 0 }
   0x6   :  { %15 = vsyncpa [#allocation9 + $0x1], 0 }
   0x7   :  { %16 = vsyncpa [#allocation12], 0 }
   0x8   :  { %17 = vsyncpa [#allocation7], 0 }
   0x9   :  { %19 = vsyncpa [#allocation7 + $0x1], 0  ;;  %s1172_s18 = smov 0   ;;  %s1174_s19 = smov 0  }
   0xa   :  { %s1176_s20 = smov 0   ;;  %s1178_s21 = smov 0  }
   0xb LB: > { %1470 = sst [smem:[#allocation18_spill]] %s1119_s18  ;;  %s1193_s22 = sadd.s32 1, %s1131_s21   ;;  %s1131_s21 = sphi %s1178_s21, %s1496_s21   ;;  %s1127_s20 = sphi %s1176_s20, %s1500_s20   ;;  %s1123_s19 = sphi %s1174_s19, %s1499_s19   ;;  %s1119_s18 = sphi %s1172_s18, %s1498_s18  }
   0xc   : > { %1471 = sst [smem:[#allocation19_spill]] %s1131_s21  ;;  %s32_s23 = sadd.s32 1, %s1127_s20 }
   0xd   : > { %1472 = sst [smem:[#allocation20_spill]] %s1193_s22  ;;  %s29_s24 = ssub.s32 %s1131_s21, %s1193_s22 }
   0xe   : > { %p1456_p0 = scmp.ne.s32.totalorder %s1127_s20, %s1123_s19  ;;  %p30_p1 = scmp.eq.s32.totalorder %s29_s24, 0 }
   0xf   : > { %p40_p2 = scmp.eq.s32.totalorder %s1131_s21, 0  ;;  %p899_p4 = scmp.lt.s32.totalorder %s1131_s21, 2 }
  0x10   : > { %s1204_s25 = scalar_select %p30_p1, %s1127_s20, %s32_s23  }
  0x11   : > { %p41_p5 = por %p40_p2, %p1456_p0  ;;  %s1457_s26 = sand.u32 1, %s1127_s20  }
  0x12   : > { %1473 = sst [smem:[#allocation21_spill]] %s1204_s25  ;;  %s1212_s27 = sshll.u32 %s1457_s26, 3 }
  0x13   : > { %s1215_s28 = sshll.u32 %s1131_s21, 7  ;;  %p1217_p6 = pnand %p899_p4, %p41_p5 }
  0x14   : > { %s223_s30 = sand.u32 1, %s1131_s21   ;;  %s1475_s1 = sld [smem:[#allocation23_spill]] }
  0x15   : > { %s227_s9 = scalar_lea.vmem [#allocation8], %s1212_s27  ;;  %s1229_s11 = scalar_lea.sflag [#allocation9], %s223_s30 }
  0x16   : > { %s234_s10 = sshll.u32 %s227_s9, 4  ;;  %p1235_p8 = pneg %p1217_p6  ;;  %s235_s10 = int_to_ptr.vmem [resolvable:$true] %s234_s10 }
  0x1a   : > { %s1226_s8 = scalar_lea.hbm %s1475_s1, %s1215_s28  ;;  %s954_s16 = scalar_lea.hbm %s1475_s1, 256 }
  0x1b   : > { %s949_s12 = scalar_lea.hbm %s1226_s8, 128  ;;  %p955_p11 = scmp.lt.s32.totalorder %s1226_s8, %s1475_s1 }
  0x1c   : > { %p950_p7 = scmp.ne.s32.totalorder %s1226_s8, %s949_s12  ;;  %p956_p12 = scmp.lt.s32.totalorder %s954_s16, %s949_s12 }
  0x1e   : > { %p952_p9 = pnand %p1235_p8, %p950_p7  ;;  %p957_p13 = por %p956_p12, %p955_p11 }
  0x20   : > { %p953_p10 = pneg %p952_p9 }
  0x22   : > { %p958_p1 = pnand %p957_p13, %p953_p10 }
  0x24   : > { %961 = shalt.err (!%p958_p1)
}
  0x25   : > { %s962_s24 = scalar_lea.vmem %s235_s10, 128  ;;  %s1133_s30 = smov [#allocation8]  }
  0x26   : > { %p963_p2 = scmp.ne.s32.totalorder %s235_s10, %s962_s24  ;;  %s967_s6 = sshll.u32 %s1133_s30, 4  ;;  %s968_s6 = int_to_ptr.vmem [resolvable:$false] %s967_s6 }
  0x27   : > { %s969_s7 = scalar_lea.vmem %s968_s6, 256  ;;  %p970_p7 = scmp.lt.s32.totalorder %s235_s10, %s968_s6 }
  0x28   : > { %p965_p4 = pnand %p963_p2, %p1235_p8  ;;  %p971_p9 = scmp.lt.s32.totalorder %s969_s7, %s962_s24 }
  0x2a   : > { %p966_p5 = pneg %p965_p4  ;;  %p972_p3 = por %p971_p9, %p970_p7 }
  0x2c   : > { %p973_p0 = pnand %p972_p3, %p966_p5 }
  0x2e   : > { %976 = shalt.err (!%p973_p0)
}
  0x2f   : > { %890 = dma.hbm_to_vmem [thread:$0]  (!%p1217_p6), %s1226_s8, 128, %s235_s10, %s1229_s11  }
  0x30   : > { %s1255_s9 = sadd.s32 4294967295, %s1131_s21   ;;  %s784_s12 = sadd.s32 4294967294, %s1131_s21  }
  0x31   : > { %p45_p0 = scmp.ne.s32.totalorder %s1123_s19, %s1119_s18  ;;  %p1458_p3 = scmp.eq.s32.totalorder %s1255_s9, 0 }
  0x32   : > { %p163_p10 = scmp.eq.s32.totalorder %s1255_s9, 1  ;;  %p169_p11 = scmp.eq.s32.totalorder %s784_s12, 1 }
  0x33   : > { %p1264_p12 = por %p1458_p3, %p45_p0  ;;  %p785_p13 = scmp.ge.s32.totalorder %s1131_s21, 1 }
  0x34   : > { %p1478_p1 = scmp.ne.s32.totalorder %s1127_s20, %s1123_s19  ;;  %p1276_p4 = por %p169_p11, %p45_p0 }
  0x35   : > { %s1477_s14 = scalar_select %p1264_p12, 1, 0 }
  0x36   : > { %p1272_p2 = por %p163_p10, %p1478_p1  ;;  %p176_p5 = scmp.lt.s32.totalorder %s1131_s21, 3 }
  0x37   : > { %s1480_s10 = scalar_select %p1276_p4, 1, 0 }
  0x38   : > { %s1479_s8 = scalar_select %p1272_p2, 1, 0 }
  0x39   : > { %1481 = sst [smem:[#allocation22_spill]] %s1480_s10  ;;  %p1281_p7 = pnand %p785_p13, %p176_p5 }
  0x3a   : > { %s1134_s16 = smov [#allocation11]   ;;  %s1291_s30 = scalar_lea.hbm %s1450_s0, %s1215_s28 }
  0x3b   : > { %s1482_s15 = scalar_select %p1281_p7, 1, 0 }
  0x3c   : > { %s188_s17 = sshll.u32 %s1134_s16, 4  ;;  %p880_p9 = pneg %p1281_p7  ;;  %s189_s17 = int_to_ptr.vmem [resolvable:$true] %s188_s17 }
  0x3d   : > { %s209_s7 = scalar_lea.vmem [#allocation5], %s1212_s27  ;;  %s1306_s1 = scalar_lea.hbm %s1452_s2, %s1215_s28 }
  0x3e   : > { %p1295_p0 = pnand %p880_p9, %p1458_p3  ;;  %s216_s12 = sshll.u32 %s209_s7, 4  ;;  %s1300_s12 = int_to_ptr.vmem [resolvable:$true] %s216_s12 }
  0x3f   : > { %s988_s23 = scalar_lea.vmem %s189_s17, 768  ;;  %p996_p5 = scmp.lt.s32.totalorder %s189_s17, %s189_s17 }
  0x40   : > { %p979_p10 = pneg %p1295_p0  ;;  %p989_p11 = scmp.ne.s32.totalorder %s189_s17, %s988_s23 }
  0x41   : > { %p997_p9 = scmp.lt.s32.totalorder %s988_s23, %s988_s23 }
  0x42   : > { %p991_p13 = pnand %p989_p11, %p979_p10 }
  0x43   : > { %p998_p3 = por %p997_p9, %p996_p5 }
  0x44   : > { %p992_p1 = pneg %p991_p13 }
  0x46   : > { %p999_p4 = pnand %p998_p3, %p992_p1 }
  0x48   : > { %1002 = shalt.err (!%p999_p4)
}
  0x49   : > { %s1135_s24 = smov 64   ;;  %s1136_s26 = smov 4  }
  0x4a   : > { %883 = dma.hbm_to_vmem [thread:$0]  (!%p1295_p0), %s1453_s3, 768, %s189_s17, [#allocation12], %s1135_s24, %s1135_s24, %s1136_s26  }
  0x4b   : > { %s1484_s16 = sand.u32 1, %s1127_s20   ;;  %s1003_s22 = scalar_lea.hbm %s1291_s30, 128 }
  0x4c   : > { %s206_s25 = scalar_lea.sflag [#allocation6], %s1484_s16  ;;  %p1004_p10 = scmp.ne.s32.totalorder %s1291_s30, %s1003_s22 }
  0x4d   : > { %s1008_s10 = scalar_lea.hbm %s1450_s0, 256  ;;  %p1009_p11 = scmp.lt.s32.totalorder %s1291_s30, %s1450_s0 }
  0x4e   : > { %p1006_p3 = pnand %p1004_p10, %p1235_p8  ;;  %p1010_p13 = scmp.lt.s32.totalorder %s1008_s10, %s1003_s22 }
  0x50   : > { %p1007_p4 = pneg %p1006_p3  ;;  %p1011_p1 = por %p1010_p13, %p1009_p11 }
  0x52   : > { %p1012_p5 = pnand %p1011_p1, %p1007_p4 }
  0x54   : > { %1015 = shalt.err (!%p1012_p5)
}
  0x55   : > { %s1016_s17 = scalar_lea.vmem %s1300_s12, 128  ;;  %s1137_s6 = smov [#allocation5]  }
  0x56   : > { %p1017_p0 = scmp.ne.s32.totalorder %s1300_s12, %s1016_s17  ;;  %s1021_s21 = sshll.u32 %s1137_s6, 4  ;;  %s1022_s21 = int_to_ptr.vmem [resolvable:$false] %s1021_s21 }
  0x57   : > { %s1023_s24 = scalar_lea.vmem %s1022_s21, 256  ;;  %p1024_p3 = scmp.lt.s32.totalorder %s1300_s12, %s1022_s21 }
  0x58   : > { %p1019_p9 = pnand %p1017_p0, %p1235_p8  ;;  %p1025_p2 = scmp.lt.s32.totalorder %s1023_s24, %s1016_s17 }
  0x5a   : > { %p1020_p10 = pneg %p1019_p9  ;;  %p1026_p12 = por %p1025_p2, %p1024_p3 }
  0x5c   : > { %p1027_p7 = pnand %p1026_p12, %p1020_p10 }
  0x5e   : > { %1030 = shalt.err (!%p1027_p7)
}
  0x5f   : > { %887 = dma.hbm_to_vmem [thread:$0]  (!%p1217_p6), %s1291_s30, 128, %s1300_s12, %s206_s25  }
  0x60   : > { %s245_s5 = scalar_lea.vmem [#allocation10], %s1212_s27  ;;  %s1031_s22 = scalar_lea.hbm %s1306_s1, 128 }
  0x61   : > { %s252_s18 = sshll.u32 %s245_s5, 4  ;;  %p1032_p4 = scmp.ne.s32.totalorder %s1306_s1, %s1031_s22  ;;  %s253_s18 = int_to_ptr.vmem [resolvable:$true] %s252_s18 }
  0x62   : > { %s1036_s28 = scalar_lea.hbm %s1452_s2, 256  ;;  %p1037_p12 = scmp.lt.s32.totalorder %s1306_s1, %s1452_s2 }
  0x63   : > { %p1034_p11 = pnand %p1032_p4, %p1235_p8  ;;  %p1038_p7 = scmp.lt.s32.totalorder %s1036_s28, %s1031_s22 }
  0x65   : > { %p1035_p2 = pneg %p1034_p11  ;;  %p1039_p13 = por %p1038_p7, %p1037_p12 }
  0x67   : > { %p1040_p1 = pnand %p1039_p13, %p1035_p2 }
  0x69   : > { %1043 = shalt.err (!%p1040_p1)
}
  0x6a   : > { %s1044_s25 = scalar_lea.vmem %s253_s18, 128  ;;  %s1138_s27 = smov [#allocation10]  }
  0x6b   : > { %p1045_p5 = scmp.ne.s32.totalorder %s253_s18, %s1044_s25  ;;  %s1049_s30 = sshll.u32 %s1138_s27, 4  ;;  %s1050_s30 = int_to_ptr.vmem [resolvable:$false] %s1049_s30 }
  0x6c   : > { %s1051_s12 = scalar_lea.vmem %s1050_s30, 256  ;;  %p1052_p10 = scmp.lt.s32.totalorder %s253_s18, %s1050_s30 }
  0x6d   : > { %p1047_p0 = pnand %p1045_p5, %p1235_p8  ;;  %p1053_p3 = scmp.lt.s32.totalorder %s1051_s12, %s1044_s25 }
  0x6f   : > { %p1048_p9 = pneg %p1047_p0  ;;  %p1054_p4 = por %p1053_p3, %p1052_p10 }
  0x71   : > { %p1055_p11 = pnand %p1054_p4, %p1048_p9 }
  0x73   : > { %1058 = shalt.err (!%p1055_p11)
}
  0x74   : > { %893 = dma.hbm_to_vmem [thread:$0]  (!%p1217_p6), %s1306_s1, 128, %s253_s18, %s1229_s11  }
  0x75   : > { %p1485_p2 = scmp.ne.s32.totalorder %s1482_s15, 0 }
  0x76   : > { %s1358_s13 = sand.u32 (!%p1485_p2), 1, %s1123_s19   ;;  %p1486_p8 = scmp.ne.s32.totalorder (!%p1485_p2), %s1477_s14, 0 }
  0x77   : > { %261 = sbr.rel (%p1485_p2) target bundleno = 1061 (0x425), region = 40  ;;  %s1361_s23 = sshll.u32 (!%p1485_p2), %s1358_s13, 3 }
  0x78   : > { %s264_s17 = scalar_lea.sflag (!%p1485_p2), [#allocation6], %s1358_s13  ;;  %s267_s6 = scalar_lea.vmem (!%p1485_p2), [#allocation5], %s1361_s23 }
  0x7c   : > { %1102 = dma.done.wait (%p1486_p8), %s264_s17, 128  }
  0x7d   : > { %1104 = vsyncadd (%p1486_p8), %s264_s17, 4294967168  ;;  %s272_s1 = sand.u32 1, %s1255_s9   ;;  %s276_s11 = scalar_lea.vmem [#allocation8], %s1361_s23 }
  0x7e   : > { %s273_s29 = scalar_lea.sflag [#allocation9], %s272_s1 }
  0x7f   : > { %1106 = dma.done.wait (%p1486_p8), %s273_s29, 256  }
  0x80   : > { %1108 = vsyncadd (%p1486_p8), %s273_s29, 4294967040  ;;  %s285_s15 = scalar_lea.vmem [#allocation10], %s1361_s23  ;;  %p1487_p6 = scmp.eq.s32.totalorder %s1255_s9, 0 }
  0x82   : > { %1110 = dma.done.wait (%p1487_p6), [#allocation12], 768   ;;  %p1488_p12 = pmov %p1487_p6 }
  0x83   : > { %v1139_v0 = vmov 0.0   ;;  %vm1140_vm0 = vmmov 0   ;;  %v939_v1 = vld [vmem:[#allocation11 + $0x18] sm:$0xff]   ;;  %v940_v2 = vld [vmem:[#allocation11 + $0x8] sm:$0xff]   ;;  %v941_v3 = vld [vmem:[#allocation11 + $0x10] sm:$0xff]   ;;  %vm370_vm1 = vcmask 261120  }
  0x84   : > { %1112 = vsyncadd (%p1488_p12), [#allocation12], 4294966528  ;;  %840 = vmatprep.subr.bf16.mxu1 %v1139_v0  ;;  %832 = vmatprep.subr.bf16.mxu0 %v1139_v0  ;;  %v942_v4 = vld [vmem:[#allocation11] sm:$0xff]   ;;  %v346_v6 = vld [vmem:[%s267_s6] sm:$0xff]  ;;  %vm585_vm2 = vcmask 64512   ;;  %vm601_vm3 = vcmask 1043456  }
  0x85   : > { %844 = vmatprep.mubr.msk.bf16.mxu1 %vm1140_vm0, %v1139_v0  ;;  %836 = vmatprep.mubr.msk.bf16.mxu0 %vm1140_vm0, %v1139_v0  ;;  %v348_v5 = vld [vmem:[%s276_s11] sm:$0xff]  ;;  %v347_v8 = vpack.c.bf16 %v346_v6, %v346_v6  ;;  %v806_v9 = vld [vmem:[%s1454_s4 + $0x1] ss:$0 sm:$0xff]  ;;  %v802_v12 = vld [vmem:[%s1454_s4] ss:$0 sm:$0xff]  ;;  %s816_s10 = sshll.u32 %s1255_s9, 7 }
  0x86   : > { %841 = vmatpush3.bf16.msra.mxu1 %v939_v1  ;;  %833 = vmatpush3.bf16.msra.mxu0 %v940_v2  ;;  %v349_v7 = vpack.c.bf16 %v348_v5, %v348_v5  ;;  %v943_v23 = vld [vmem:[#allocation11 + $0x28] sm:$0xff]   ;;  %v944_v24 = vld [vmem:[#allocation11 + $0x20] sm:$0xff]   ;;  %v350_v25 = vld [vmem:[%s285_s15] sm:$0xff]  ;;  %s325_s26 = scalar_lea.vmem [#allocation13], %s1361_s23  ;;  %vm645_vm4 = vcmask 130048   ;;  %s1489_s25 = sld [smem:[#allocation24_spill]] }
  0x87   : > { %842 = vmatprep.subr.bf16.mxu1 %v1139_v0  ;;  %834 = vmatprep.subr.bf16.mxu0 %v1139_v0  ;;  %v351_v26 = vpack.c.bf16 %v350_v25, %v350_v25  ;;  %v810_v37 = vld [vmem:[%s1454_s4 + $0x2] ss:$0 sm:$0xff]  ;;  %s661_s28 = sshll.u32 %s325_s26, 4  ;;  %s648_s30 = scalar_lea.sflag [#allocation7], %s1358_s13  ;;  %s1409_s28 = int_to_ptr.vmem [resolvable:$true] %s661_s28 }
  0x88   : > { %s1059_s12 = scalar_lea.vmem %s1409_s28, 128  ;;  %p1490_p13 = scmp.ne.s32.totalorder %s1479_s8, 0 }
  0x89   : > { %p1060_p7 = scmp.ne.s32.totalorder %s1409_s28, %s1059_s12  ;;  %s1141_s9 = smov [#allocation13]  }
  0x8a   : > { %843 = vmatpush3.bf16.msra.mxu1 %v941_v3  ;;  %835 = vmatpush3.bf16.msra.mxu0 %v942_v4  ;;  %s1063_s23 = sshll.u32 %s1141_s9, 4  ;;  %s1064_s23 = int_to_ptr.vmem [resolvable:$false] %s1063_s23 }
  0x8b   : > { %856 = vmatprep.subr.bf16.mxu1 %v1139_v0  ;;  %848 = vmatprep.subr.bf16.mxu0 %v1139_v0  ;;  %p1061_p1 = pnand %p1060_p7, %p1490_p13  ;;  %s1065_s17 = scalar_lea.vmem %s1064_s23, 256 }
  0x8c   : > { %s1407_s27 = scalar_lea.hbm %s1489_s25, %s816_s10  ;;  %p1066_p0 = scmp.lt.s32.totalorder %s1409_s28, %s1064_s23 }
  0x8d   : > { %845 = vmatmul.mubr.msk.bf16.vlgmr.msra.gmra.mxu1 %vm370_vm1, %v349_v7  ;;  %837 = vmatmul.mubr.msk.bf16.vlgmr.msra.gmra.mxu0 %vm370_vm1, %v347_v8  ;;  %p1062_p5 = pneg %p1061_p1  ;;  %p1067_p9 = scmp.lt.s32.totalorder %s1065_s17, %s1059_s12 }
  0x8e   : > { %858 = vmatprep.mubr.msk.bf16.mxu1 %vm1140_vm0, %v1139_v0  ;;  %852 = vmatprep.mubr.msk.bf16.mxu0 %vm1140_vm0, %v1139_v0 }
  0x8f   : > { %849 = vmatpush3.bf16.msra.mxu0 %v943_v23  ;;  %p1068_p10 = por %p1067_p9, %p1066_p0 }
  0x90   : > { %850 = vmatprep.subr.bf16.mxu0 %v1139_v0 }
  0x91   : > { %p1069_p3 = pnand %p1068_p10, %p1062_p5 }
  0x93   : > { %851 = vmatpush3.bf16.msra.mxu0 %v944_v24 }
  0x94   : > { %862 = vmatprep.subr.bf16.mxu0 %v1139_v0 }
  0x96   : > { %853 = vmatmul.mubr.msk.bf16.vlgmr.msra.gmra.mxu0 %vm370_vm1, %v351_v26 }
  0x97   : > { %864 = vmatprep.mubr.msk.bf16.mxu0 %vm1140_vm0, %v1139_v0 }
 0x14d   : > { %v470_v10 = vpop.f32.mrf.mxu1  ;;  %v408_v13 = vpop.f32.mrf.mxu0 }
 0x14e   : > { %v471_v11 = vadd.f32 %v806_v9, %v470_v10  ;;  %v409_v17 = vadd.f32 %v802_v12, %v408_v13 }
 0x14f   : > { %v846_v14 = vpop.f32.mrf.mxu1  ;;  %v838_v16 = vpop.f32.mrf.mxu0 }
 0x150   : > { %v542_v15 = vpack.c.bf16 %v471_v11, %v471_v11  ;;  %v540_v22 = vpack.c.bf16 %v409_v17, %v409_v17 }
 0x151   : > { %v473_v18 = vpop.f32.mrf.mxu1  ;;  %v411_v19 = vpop.f32.mrf.mxu0 }
 0x152   : > { %857 = vmatpush3.bf16.xpose.msra.mxu1 %v542_v15 }
 0x153   : > { %v847_v20 = vpop.f32.mrf.mxu1  ;;  %v839_v21 = vpop.f32.mrf.mxu0 }
 0x156   : > { %v532_v38 = vpop.f32.mrf.mxu0 }
 0x157   : > { %v533_v39 = vadd.f32 %v810_v37, %v532_v38 }
 0x158   : > { %v854_v40 = vpop.f32.mrf.mxu0 }
 0x159   : > { %859 = vmatmul.mubr.bf16.vlgmr.msra.gmra.mxu1 %v540_v22  ;;  %v544_v41 = vpack.c.bf16 %v533_v39, %v533_v39 }
 0x15a   : > { %v535_v42 = vpop.f32.mrf.mxu0 }
 0x15b   : > { %v603_v43 = vsel %vm601_vm3, %v544_v41, 0 }
 0x15c   : > { %v855_v44 = vpop.f32.mrf.mxu0  ;;  %863 = vmatpush3.bf16.msra.mxu0 %v603_v43 }
 0x219   : > { %v579_v27 = vpop.f32.mrf.mxu1 }
 0x21a   : > { %v586_v28 = vsel %vm585_vm2, %v579_v27, -inf }
 0x21b   : > { %587 = vmax.xlane.f32.xlu0 %v586_v28  ;;  %v860_v29 = vpop.f32.mrf.mxu1 }
 0x21d   : > { %v582_v30 = vpop.f32.mrf.mxu1 }
 0x21f   : > { %v861_v31 = vpop.f32.mrf.mxu1 }
 0x2a4   : > { %v588_v32 = vpop.xlane.xlu0 %587 }
 0x2a5   : > { %v589_v33 = vsub.f32 %v579_v27, %v588_v32 }
 0x2a7   : > { %v590_v34 = vmul.f32 1.442695, %v589_v33 }
 0x2a9   : > { %945 = vpow2.f32 %v590_v34 }
 0x2b6   : > { %v946_v35 = vpop.eup %945 }
 0x2b7   : > { %v592_v36 = vsel %vm585_vm2, %v946_v35, 0.0 }
 0x2b8   : > { %593 = vadd.xlane.f32.xlu0 %v592_v36 }
 0x341   : > { %v594_v45 = vpop.xlane.xlu0 %593 }
 0x342   : > { %947 = vrcp.f32 %v594_v45 }
 0x34f   : > { %v948_v46 = vpop.eup %947 }
 0x350   : > { %v596_v47 = vmul.f32 %v948_v46, %v946_v35 }
 0x352   : > { %v597_v48 = vpack.c.bf16 %v596_v47, %v596_v47 }
 0x354   : > { %865 = vmatmul.mubr.msk.bf16.vlgmr.msra.gmra.mxu0 %vm585_vm2, %v597_v48 }
 0x414   : > { %v639_v49 = vpop.f32.mrf.mxu0 }
 0x415   : > { %646 = vst.msk [vmem:[%s325_s26] sm:$0xff] %vm645_vm4, %v639_v49 }
 0x416   : > { %v866_v50 = vpop.f32.mrf.mxu0 }
 0x417   : > { %1072 = shalt.err (!%p1069_p3)
}
 0x418   : > { %s1073_s6 = scalar_lea.hbm %s1407_s27, 128  ;;  %s1077_s29 = scalar_lea.hbm %s1489_s25, 256 }
 0x419   : > { %p1074_p4 = scmp.ne.s32.totalorder %s1407_s27, %s1073_s6  ;;  %p1078_p8 = scmp.lt.s32.totalorder %s1407_s27, %s1489_s25 }
 0x41a   : > { %p1079_p6 = scmp.lt.s32.totalorder %s1077_s29, %s1073_s6 }
 0x41b   : > { %p1075_p11 = pnand %p1074_p4, %p1490_p13 }
 0x41c   : > { %p1080_p12 = por %p1079_p6, %p1078_p8 }
 0x41d   : > { %p1076_p2 = pneg %p1075_p11 }
 0x41f   : > { %p1081_p7 = pnand %p1080_p12, %p1076_p2 }
 0x421   : > { %1084 = shalt.err (!%p1081_p7)
}
 0x422   : > { %878 = dma.vmem_to_hbm [thread:$0]  (%p1490_p13), %s1409_s28, 128, %s1407_s27, %s648_s30   ;;  %v642_v51 = vpop.f32.mrf.mxu0 }
 0x424   : > { %v867_v52 = vpop.f32.mrf.mxu0 }
 0x425 PF: > { %s1491_s14 = sld [smem:[#allocation18_spill]] }
 0x426   : > { %s1492_s21 = sld [smem:[#allocation22_spill]] }
 0x427   : > { %s1493_s24 = sld [smem:[#allocation19_spill]] }
 0x42b   : > { %s673_s5 = sand.u32 1, %s1491_s14  }
 0x42c   : > { %p1494_p1 = scmp.ne.s32.totalorder %s1492_s21, 0  ;;  %s674_s18 = scalar_lea.sflag [#allocation7], %s673_s5 }
 0x42d   : > { %p1495_p5 = scmp.ge.s32.totalorder %s1493_s24, 2 }
 0x42f   : > { %p895_p0 = pnand %p1495_p5, %p1494_p1 }
 0x431   : > { %p896_p9 = pneg %p895_p0 }
 0x433   : > { %1114 = dma.done.wait (%p896_p9), %s674_s18, 128  }
 0x434   : > { %1116 = vsyncadd (%p896_p9), %s674_s18, 4294967168  ;;  %s1496_s21 = sld [smem:[#allocation20_spill]]  ;;  %s1498_s18 = smov %s1123_s19 }
 0x435   : > { %s1497_s8 = sld [smem:[#allocation21_spill]]  ;;  %s1499_s19 = smov %s1127_s20 }
 0x43a   : > { %p22_p13 = scmp.ge.s32.totalorder %s1496_s21, 4  }
 0x43b   : > { %s1500_s20 = smov %s1497_s8 }
 0x43c   :  { %24 = sbr.rel (!%p22_p13) target bundleno = 11 (0xb), region = 117 }
 0x441   :  { %679 = vsyncpa [#allocation6], 1 }
 0x442   :  { %681 = vsyncpa [#allocation6 + $0x1], 1 }
 0x443   :  { %682 = vsyncpa [#allocation9], 1 }
 0x444   :  { %684 = vsyncpa [#allocation9 + $0x1], 1 }
 0x445   :  { %685 = vsyncpa [#allocation12], 1 }
 0x446   :  { %686 = vsyncpa [#allocation7], 1 }
 0x447   :  { %688 = vsyncpa [#allocation7 + $0x1], 1 }

</bundles_post_ra>
